<compile_context>
chip_gen: v7x
topology: tpu7x:2x2x1
jax: 0.10.0
libtpu: 0.0.40
codegen_flags: <defaults>
</compile_context>

<pallas_src>
import jax
import jax.numpy as jnp
from jax.experimental import pallas as pl
from jax.experimental.pallas import tpu as pltpu


def _lsa_kernel(annot_ref, locu_ref, pq_ref, wa_ref, wl_ref, v_ref, out_ref):
    """One (seq-tile j, batch b) grid step of the fused attention forward."""
    b = pl.program_id(1)

    a = annot_ref[0]                      # (tT, Da)  bf16 annotation tile
    u = locu_ref[0]                       # (tT, Ku)  bf16 im2col'd location tile

    # Two bf16 MXU matmuls, f32 accumulation.
    pa = jnp.dot(a, wa_ref[...], preferred_element_type=jnp.float32)      # (tT, A)
    ploc = jnp.dot(u, wl_ref[...], preferred_element_type=jnp.float32)    # (tT, A)

    # Query projection + all biases were hoisted to the wrapper (pq_ref row b).
    h = jnp.tanh(pa + ploc + pq_ref[b])   # (tT, A) f32; (1, A) broadcasts over rows

    # v-projection as VPU multiply + lane reduce (MXU stays free for the matmuls).
    s = jnp.sum(h * v_ref[...], axis=-1)  # (tT,) f32

    # Lane-dense store: alignment row for batch b of this seq tile.
    out_ref[pl.ds(b, 1), :] = s[None, :].astype(out_ref.dtype)


def location_sensitive_attention(params, annot, query, loc, *, seq_tile=1024):
    """Pallas forward of LocationSensitiveAttention.

    params use PyTorch layouts:
      conv_w  (filters, 2, K)          Conv1d weight, bias=False
      loc_w   (A, filters),  loc_b   (A,)
      query_w (A, Dq),       query_b (A,)
      annot_w (A, Da),       annot_b (A,)
      v_w     (1, A)
    annot (B, T, Da), query (B, Dq) or (B, 1, Dq), loc (B, 2, T)
    returns alignment (B, T) float32.
    """
    if query.ndim == 2:
        query = query[:, None, :]

    B, T, Da = annot.shape
    conv_w = params["conv_w"].astype(jnp.float32)
    _, cin, K = conv_w.shape
    A = params["loc_w"].shape[0]
    Ku = cin * K

    # ---- location branch: fuse Conv1d with loc_linear; im2col via K strided slices ----
    pad = (K - 1) // 2
    loc_p = jnp.pad(loc.astype(jnp.float32), ((0, 0), (0, 0), (pad, pad)))   # (B, 2, T+2p)
    u = jnp.stack([loc_p[:, :, k:k + T] for k in range(K)], axis=-1)         # (B, 2, T, K)
    u = jnp.transpose(u, (0, 2, 1, 3)).reshape(B, T, Ku)                     # (B, T, 2K)

    # Wf[(c,k), a] = sum_f conv_w[f, c, k] * loc_w[a, f]
    wl = jnp.einsum("fck,af->cka", conv_w,
                    params["loc_w"].astype(jnp.float32)).reshape(Ku, A)

    # ---- query projection + all biases hoisted (one tiny XLA matmul) ----
    pqb = (jnp.einsum("bod,ad->boa", query.astype(jnp.float32),
                      params["query_w"].astype(jnp.float32))
           + params["query_b"].astype(jnp.float32)
           + params["annot_b"].astype(jnp.float32)
           + params["loc_b"].astype(jnp.float32)).astype(jnp.float32)        # (B, 1, A)

    # ---- streamed MXU operands in bf16 (f32 accumulation inside the kernel) ----
    annot_bf = annot.astype(jnp.bfloat16)
    u_bf = u.astype(jnp.bfloat16)
    wa = params["annot_w"].astype(jnp.float32).T.astype(jnp.bfloat16)        # (Da, A)
    wl_bf = wl.astype(jnp.bfloat16)                                          # (Ku, A)
    vrow = params["v_w"].astype(jnp.float32).reshape(1, A)                   # (1, A) f32

    # ---- generation-aware VMEM limit & seq tile ----
    try:
        vmem_cap = int(pltpu.get_tpu_info().vmem_capacity_bytes)
    except Exception:
        vmem_cap = 64 * 1024 * 1024      # conservative (v7x-sized) fallback
    vmem_limit = min((vmem_cap * 3) // 4, 96 * 1024 * 1024)

    # double-buffered bf16 annot + u tiles should stay well under the limit
    row_bytes = 2 * 2 * (Da + Ku)
    tT_cap = max(128, ((vmem_limit // 3) // row_bytes) // 128 * 128)
    tT = min(max(128, (seq_tile // 128) * 128), tT_cap)
    if T <= tT:
        tT = T                            # full-extent block (always legal)
    nT = pl.cdiv(T, tT)

    flops = 2 * B * T * (Da + Ku + 2) * A
    bytes_accessed = (2 * B * T * (Da + Ku) + 4 * B * T + 4 * B * A
                      + 2 * (Da + Ku) * A + 4 * A)

    out = pl.pallas_call(
        _lsa_kernel,
        out_shape=jax.ShapeDtypeStruct((B, T), jnp.float32),
        grid=(nT, B),
        in_specs=[
            pl.BlockSpec((1, tT, Da), lambda j, b: (b, j, 0)),   # annot tile (bf16)
            pl.BlockSpec((1, tT, Ku), lambda j, b: (b, j, 0)),   # im2col loc tile (bf16)
            pl.BlockSpec((B, 1, A), lambda j, b: (0, 0, 0)),     # hoisted query+biases
            pl.BlockSpec((Da, A), lambda j, b: (0, 0)),          # annot_layer W (bf16)
            pl.BlockSpec((Ku, A), lambda j, b: (0, 0)),          # fused conv∘loc_linear W
            pl.BlockSpec((1, A), lambda j, b: (0, 0)),           # v row (f32)
        ],
        # Lane-dense (B, tT) output block, resident across the inner batch axis.
        out_specs=pl.BlockSpec((B, tT), lambda j, b: (0, j)),
        compiler_params=pltpu.CompilerParams(
            dimension_semantics=("parallel", "arbitrary"),
            vmem_limit_bytes=int(vmem_limit),
        ),
        cost_estimate=pl.CostEstimate(
            flops=int(flops),
            transcendentals=int(B * T * A),
            bytes_accessed=int(bytes_accessed),
        ),
    )(annot_bf, u_bf, pqb, wa, wl_bf, vrow)

    return out                                                   # (B, T) == squeeze(-1)


def _reference_forward(params, annot, query, loc):
    """Pure-JAX transcription of the PyTorch forward (independent of the kernel path)."""
    if query.ndim == 2:
        query = query[:, None, :]
    conv_w = params["conv_w"]
    F, _, K = conv_w.shape
    B, _, T = loc.shape
    pad = (K - 1) // 2
    loc_p = jnp.pad(loc, ((0, 0), (0, 0), (pad, pad)))
    hp = jax.lax.Precision.HIGHEST
    conv_out = jnp.zeros((B, F, T), jnp.float32)
    for k in range(K):  # literal Conv1d (cross-correlation) definition
        conv_out = conv_out + jnp.einsum("bct,fc->bft", loc_p[:, :, k:k + T],
                                         conv_w[:, :, k], precision=hp)
    ploc = jnp.einsum("bft,af->bta", conv_out, params["loc_w"], precision=hp) + params["loc_b"]
    pq = jnp.einsum("bod,ad->boa", query, params["query_w"], precision=hp) + params["query_b"]
    pa = jnp.einsum("btd,ad->bta", annot, params["annot_w"], precision=hp) + params["annot_b"]
    h = jnp.tanh(pq + pa + ploc)
    return jnp.einsum("bta,oa->bto", h, params["v_w"], precision=hp)[..., 0]


if __name__ == "__main__":
    key = jax.random.PRNGKey(0)
    ks = jax.random.split(key, 11)

    B, T = 2, 8
    annot_dim, query_dim, attn_dim = 32, 32, 32
    filters, kernel_size = 32, 31

    params = {
        "conv_w": 0.1 * jax.random.normal(ks[0], (filters, 2, kernel_size), jnp.float32),
        "loc_w": 0.1 * jax.random.normal(ks[1], (attn_dim, filters), jnp.float32),
        "loc_b": 0.1 * jax.random.normal(ks[2], (attn_dim,), jnp.float32),
        "query_w": 0.1 * jax.random.normal(ks[3], (attn_dim, query_dim), jnp.float32),
        "query_b": 0.1 * jax.random.normal(ks[4], (attn_dim,), jnp.float32),
        "annot_w": 0.1 * jax.random.normal(ks[5], (attn_dim, annot_dim), jnp.float32),
        "annot_b": 0.1 * jax.random.normal(ks[6], (attn_dim,), jnp.float32),
        "v_w": 0.1 * jax.random.normal(ks[7], (1, attn_dim), jnp.float32),
    }
    annot = jax.random.normal(ks[8], (B, T, annot_dim), dtype=jnp.float32)
    query = jax.random.normal(ks[9], (B, query_dim), dtype=jnp.float32)   # 2-D query path
    loc = jax.random.normal(ks[10], (B, 2, T), dtype=jnp.float32)

    align = jax.block_until_ready(location_sensitive_attention(params, annot, query, loc))

    ref = _reference_forward(params, annot, query, loc)
    assert align.shape == (B, T), align.shape
    # bf16 streamed operands with f32 accumulation -> loosened tolerance vs pure-f32 ref.
    assert jnp.allclose(align, ref, rtol=2e-2, atol=2.5e-2), (align, ref)
    print("KERNEL_OK")
</pallas_src>

<mosaic_0001>
module attributes {stable_mosaic.version = 11 : i64} {
  func.func @_lsa_kernel(%arg0: i32, %arg1: i32, %arg2: memref<1x8x32xbf16, #tpu.memory_space<vmem>>, %arg3: memref<1x8x62xbf16, #tpu.memory_space<vmem>>, %arg4: memref<2x1x32xf32, #tpu.memory_space<vmem>>, %arg5: memref<32x32xbf16, #tpu.memory_space<vmem>>, %arg6: memref<62x32xbf16, #tpu.memory_space<vmem>>, %arg7: memref<1x32xf32, #tpu.memory_space<vmem>>, %arg8: memref<2x8xf32, #tpu.memory_space<vmem>>) attributes {dimension_semantics = [#tpu.dimension_semantics<parallel>, #tpu.dimension_semantics<arbitrary>], iteration_bounds = array<i64: 1, 2>, scalar_prefetch = 0 : i64, scratch_operands = 0 : i64, tpu.core_type = #tpu.core_type<tc>, window_params = [{transform_indices = @transform_0, window_bounds = array<i64: 1, 8, 32>}, {transform_indices = @transform_1, window_bounds = array<i64: 1, 8, 62>}, {pipeline_mode = #tpu.pipeline_mode<synchronous>, transform_indices = @transform_2, window_bounds = array<i64: 2, 1, 32>}, {pipeline_mode = #tpu.pipeline_mode<synchronous>, transform_indices = @transform_3, window_bounds = array<i64: 32, 32>}, {pipeline_mode = #tpu.pipeline_mode<synchronous>, transform_indices = @transform_4, window_bounds = array<i64: 62, 32>}, {pipeline_mode = #tpu.pipeline_mode<synchronous>, transform_indices = @transform_5, window_bounds = array<i64: 1, 32>}, {transform_indices = @transform_6, window_bounds = array<i64: 2, 8>}]} {
    %c0 = arith.constant 0 : index
    %c0_0 = arith.constant 0 : index
    %c0_1 = arith.constant 0 : index
    %0 = vector.load %arg2[%c0, %c0_0, %c0_1] : memref<1x8x32xbf16, #tpu.memory_space<vmem>>, vector<1x8x32xbf16>
    %1 = vector.shape_cast %0 : vector<1x8x32xbf16> to vector<8x32xbf16>
    %c0_2 = arith.constant 0 : index
    %c0_3 = arith.constant 0 : index
    %c0_4 = arith.constant 0 : index
    %2 = vector.load %arg3[%c0_2, %c0_3, %c0_4] : memref<1x8x62xbf16, #tpu.memory_space<vmem>>, vector<1x8x62xbf16>
    %3 = vector.shape_cast %2 : vector<1x8x62xbf16> to vector<8x62xbf16>
    %c0_5 = arith.constant 0 : index
    %c0_6 = arith.constant 0 : index
    %4 = vector.load %arg5[%c0_5, %c0_6] : memref<32x32xbf16, #tpu.memory_space<vmem>>, vector<32x32xbf16>
    %cst = arith.constant dense<0.000000e+00> : vector<8x32xf32>
    %5 = tpu.matmul %1, %4, %cst {dimension_numbers = #tpu.dot_dimension_numbers<[1], [0], [0], [1], [0, 0, 1, 1], [], []>} : vector<8x32xbf16>, vector<32x32xbf16>, vector<8x32xf32> -> vector<8x32xf32>
    %c0_7 = arith.constant 0 : index
    %c0_8 = arith.constant 0 : index
    %6 = vector.load %arg6[%c0_7, %c0_8] : memref<62x32xbf16, #tpu.memory_space<vmem>>, vector<62x32xbf16>
    %cst_9 = arith.constant dense<0.000000e+00> : vector<8x32xf32>
    %7 = tpu.matmul %3, %6, %cst_9 {dimension_numbers = #tpu.dot_dimension_numbers<[1], [0], [0], [1], [0, 0, 1, 1], [], []>} : vector<8x62xbf16>, vector<62x32xbf16>, vector<8x32xf32> -> vector<8x32xf32>
    %8 = arith.addf %5, %7 : vector<8x32xf32>
    %9 = arith.index_cast %arg1 : i32 to index
    %c0_10 = arith.constant 0 : index
    %c0_11 = arith.constant 0 : index
    %10 = vector.load %arg4[%9, %c0_10, %c0_11] : memref<2x1x32xf32, #tpu.memory_space<vmem>>, vector<1x1x32xf32>
    %11 = vector.shape_cast %10 : vector<1x1x32xf32> to vector<1x32xf32>
    %12 = vector.broadcast %11 : vector<1x32xf32> to vector<8x32xf32>
    %13 = arith.addf %8, %12 : vector<8x32xf32>
    %14 = math.tanh %13 : vector<8x32xf32>
    %c0_12 = arith.constant 0 : index
    %c0_13 = arith.constant 0 : index
    %15 = vector.load %arg7[%c0_12, %c0_13] : memref<1x32xf32, #tpu.memory_space<vmem>>, vector<1x32xf32>
    %16 = vector.broadcast %15 : vector<1x32xf32> to vector<8x32xf32>
    %17 = arith.mulf %14, %16 : vector<8x32xf32>
    %cst_14 = arith.constant dense<0.000000e+00> : vector<8xf32>
    %18 = vector.multi_reduction <add>, %17, %cst_14 [1] : vector<8x32xf32> to vector<8xf32>
    %19 = vector.shape_cast %18 : vector<8xf32> to vector<1x8xf32>
    %20 = arith.index_cast %arg1 : i32 to index
    %c0_15 = arith.constant 0 : index
    %21 = vector.load %arg8[%20, %c0_15] : memref<2x8xf32, #tpu.memory_space<vmem>>, vector<1x8xf32>
    tpu.vector_store %arg8[%20, %c0_15], %19 {strides = array<i32>} : memref<2x8xf32, #tpu.memory_space<vmem>>, vector<1x8xf32>,
    return
  }
  func.func @transform_0(%arg0: i32, %arg1: i32) -> (i32, i32, i32) {
    %c0_i32 = arith.constant 0 : i32
    %c0_i32_0 = arith.constant 0 : i32
    return %arg1, %arg0, %c0_i32 : i32, i32, i32
  }
  func.func @transform_1(%arg0: i32, %arg1: i32) -> (i32, i32, i32) {
    %c0_i32 = arith.constant 0 : i32
    %c0_i32_0 = arith.constant 0 : i32
    return %arg1, %arg0, %c0_i32 : i32, i32, i32
  }
  func.func @transform_2(%arg0: i32, %arg1: i32) -> (i32, i32, i32) {
    %c0_i32 = arith.constant 0 : i32
    %c0_i32_0 = arith.constant 0 : i32
    %c0_i32_1 = arith.constant 0 : i32
    %c0_i32_2 = arith.constant 0 : i32
    return %c0_i32, %c0_i32_0, %c0_i32_1 : i32, i32, i32
  }
  func.func @transform_3(%arg0: i32, %arg1: i32) -> (i32, i32) {
    %c0_i32 = arith.constant 0 : i32
    %c0_i32_0 = arith.constant 0 : i32
    %c0_i32_1 = arith.constant 0 : i32
    return %c0_i32, %c0_i32_0 : i32, i32
  }
  func.func @transform_4(%arg0: i32, %arg1: i32) -> (i32, i32) {
    %c0_i32 = arith.constant 0 : i32
    %c0_i32_0 = arith.constant 0 : i32
    %c0_i32_1 = arith.constant 0 : i32
    return %c0_i32, %c0_i32_0 : i32, i32
  }
  func.func @transform_5(%arg0: i32, %arg1: i32) -> (i32, i32) {
    %c0_i32 = arith.constant 0 : i32
    %c0_i32_0 = arith.constant 0 : i32
    %c0_i32_1 = arith.constant 0 : i32
    return %c0_i32, %c0_i32_0 : i32, i32
  }
  func.func @transform_6(%arg0: i32, %arg1: i32) -> (i32, i32) {
    %c0_i32 = arith.constant 0 : i32
    %c0_i32_0 = arith.constant 0 : i32
    return %c0_i32, %arg0 : i32, i32
  }
}

</mosaic_0001>

<bundles_post_ra>
// kernel: tpu_custom_call.1
= control target key start
LH: loop header
LB: loop body
LE: loop exit
PB: predicated region body
PF: predicated region fallthrough
CT: control target
= control target key end

     0   :  { %11 = vsyncpa [#allocation3], 0  ;;  %s725_s21 = smov 0   ;;  %s727_s22 = smov 0   ;;  %s819_s0 = inlined_call_operand.vmem [shape: bf16[2,8,32], index: 0, kind: input, shape index: {}]   ;;  %s820_s1 = inlined_call_operand.vmem [shape: bf16[2,8,62], index: 1, kind: input, shape index: {}]   ;;  %s821_s2 = inlined_call_operand.vmem [shape: f32[2,1,32], index: 2, kind: input, shape index: {}]   ;;  %s822_s3 = inlined_call_operand.vmem [shape: bf16[32,32], index: 3, kind: input, shape index: {}]   ;;  %s823_s4 = inlined_call_operand.vmem [shape: bf16[62,32], index: 4, kind: input, shape index: {}]   ;;  %s824_s5 = inlined_call_operand.vmem [shape: f32[1,32], index: 5, kind: input, shape index: {}]   ;;  %s825_s6 = inlined_call_operand.hbm [shape: f32[2,8], index: 6, kind: output, shape index: {}]  }
   0x1   :  { %s729_s23 = smov 0  }
   0x2 LB: > { %s544_s24 = sadd.s32 4294967295, %s685_s23   ;;  %s26_s25 = sadd.s32 1, %s681_s22  ;;  %s685_s23 = sphi %s729_s23, %s17_s23   ;;  %s681_s22 = sphi %s727_s22, %s828_s22   ;;  %s677_s21 = sphi %s725_s21, %s827_s21  }
   0x3   : > { %p27_p0 = scmp.ge.s32.totalorder %s26_s25, 2  ;;  %p547_p1 = scmp.ge.s32.totalorder %s685_s23, 1 }
   0x4   : > { %p243_p2 = scmp.lt.s32.totalorder %s685_s23, 3 }
   0x5   : > { %s830_s25 = smov (%p27_p0, %s26_s25), 0 }
   0x6   : > { %p244_p3 = pnand %p547_p1, %p243_p2 }
   0x7   : > { %v625_v0 = vld [vmem:[%s823_s4] sm:$0xff] (!%p244_p3)   ;;  %v687_v1 = vmov (!%p244_p3), 0.0   ;;  %v626_v2 = vld [vmem:[%s823_s4 + $0x8] sm:$0xff] (!%p244_p3)   ;;  %vm688_vm0 = vmmov (!%p244_p3), 0   ;;  %p277_p4 = scmp.lt.s32.totalorder (!%p244_p3), %s677_s21, 1  ;;  %v628_v5 = vld [vmem:[%s823_s4 + $0x10] sm:$0xff] (!%p244_p3)   ;;  %s433_s29 = scalar_lea.vmem (!%p244_p3), %s821_s2, %s677_s21  ;;  %v455_v25 = vlaneseq (!%p244_p3) }
   0x8   : > { %247 = sbr.rel (%p244_p3) target bundleno = 413 (0x19d), region = 44  ;;  %572 = vmatprep.subr.bf16.mxu0 (!%p244_p3), %v687_v1  ;;  %584 = vmatprep.subr.bf16.mxu1 (!%p244_p3), %v687_v1  ;;  %v627_v3 = vld [vmem:[%s822_s3] sm:$0xff] (!%p244_p3)   ;;  %v629_v4 = vld [vmem:[%s822_s3 + $0x8] sm:$0xff] (!%p244_p3)   ;;  %v630_v6 = vld [vmem:[%s823_s4 + $0x18] sm:$0x7f] (!%p244_p3)   ;;  %vm333_vm1 = vcmask (!%p244_p3), 1046528  }
   0x9   : > { %573 = vmatpush3.bf16.msra.mxu0 (!%p244_p3), %v625_v0  ;;  %588 = vmatprep.mubr.msk.bf16.mxu1 (!%p244_p3), %vm688_vm0, %v687_v1  ;;  %vm389_vm2 = vcmask (!%p244_p3), 261120   ;;  %v335_v8 = vsel (!%p244_p3), %vm333_vm1, %v630_v6, 0  ;;  %vm329_vm3 = vcmask (!%p244_p3), 506880   ;;  %v558_v15 = vld [vmem:[%s433_s29] ss:$0 sm:$0xff] (!%p244_p3)  ;;  %v456_v26 = vand.u32 (!%p244_p3), 127, %v455_v25 }
   0xa   : > { %574 = vmatprep.subr.bf16.mxu0 (!%p244_p3), %v687_v1  ;;  %580 = vmatprep.mubr.msk.bf16.mxu0 (!%p244_p3), %vm688_vm0, %v687_v1  ;;  %v559_v21 = vld [vmem:[%s824_s5] ss:$0 sm:$0xff] (!%p244_p3)  ;;  %v458_v27 = vshrl.u32 (!%p244_p3), %v455_v25, 7  ;;  %s689_s8 = smov (!%p244_p3), [#allocation2]   ;;  %vm463_vm4 = vcmask (!%p244_p3), 57344   ;;  %p783_p5 = scmp.eq.s32.totalorder (!%p244_p3), %s544_s24, 1 }
   0xb   : > { %585 = vmatpush3.bf16.msra.mxu1 (!%p244_p3), %v627_v3  ;;  %s474_s9 = sshll.u32 (!%p244_p3), %s689_s8, 4  ;;  %s462_s11 = scalar_lea.vmem (!%p244_p3), [#allocation2], %s677_s21  ;;  %s475_s9 = int_to_ptr.vmem [resolvable:$true] %s474_s9 }
   0xc   : > { %586 = vmatprep.subr.bf16.mxu1 (!%p244_p3), %v687_v1  ;;  %v459_v28 = vsub.s32 (!%p244_p3), %v456_v26, %v458_v27  ;;  %p640_p9 = scmp.lt.s32.totalorder (!%p244_p3), %s475_s9, %s475_s9 }
   0xd   : > { %575 = vmatpush3.bf16.msra.mxu0 (!%p244_p3), %v626_v2 }
   0xe   : > { %576 = vmatprep.subr.bf16.mxu0 (!%p244_p3), %v687_v1 }
   0xf   : > { %s278_s12 = scalar_select %p277_p4, %s677_s21, 1  ;;  %587 = vmatpush3.bf16.msra.mxu1 %v629_v4 }
  0x11   : > { %s548_s15 = sshll.u32 %s278_s12, 2  ;;  %577 = vmatpush3.bf16.msra.mxu0 %v628_v5  ;;  %s633_s12 = scalar_lea.vmem %s475_s9, 32 }
  0x12   : > { %s283_s18 = scalar_lea.vmem %s819_s0, %s548_s15  ;;  %578 = vmatprep.subr.bf16.mxu0 %v687_v1  ;;  %s290_s26 = scalar_lea.vmem %s820_s1, %s548_s15 }
  0x13   : > { %v292_v7 = vld [vmem:[%s283_s18] sm:$0xf]  ;;  %p634_p6 = scmp.ne.s32.totalorder %s475_s9, %s633_s12  ;;  %p641_p10 = scmp.lt.s32.totalorder %s633_s12, %s633_s12 }
  0x14   : > { %589 = vmatmul.mubr.msk.bf16.vlgmr.msra.gmra.mrb[0].mxu1 %vm389_vm2, %v292_v7  ;;  %v293_v9 = vld [vmem:[%s290_s26] sm:$0xf] }
  0x15   : > { %579 = vmatpush3.bf16.msra.mxu0 %v335_v8  ;;  %p635_p7 = pnand %p634_p6, %p783_p5  ;;  %p642_p11 = por %p641_p10, %p640_p9 }
  0x17   : > { %p636_p8 = pneg %p635_p7 }
  0x18   : > { %581 = vmatmul.mubr.msk.bf16.vlgmr.msra.gmra.mrb[0].mxu0 %vm329_vm3, %v293_v9 }
  0x19   : > { %p643_p12 = pnand %p642_p11, %p636_p8 }
  0xe7   : > { %v427_v10 = vpop.f32.mrb[0].mxu1 }
  0xe8   : > { %v590_v11 = vpop.f32.mrb[1].mxu1 }
  0xe9   : > { %v430_v12 = vpop.f32.mrb[2].mxu1 }
  0xea   : > { %v591_v13 = vpop.f32.mrb[3].mxu1 }
  0xeb   : > { %v371_v14 = vpop.f32.mrb[0].mxu0 }
  0xec   : > { %v428_v16 = vadd.f32 %v427_v10, %v371_v14  ;;  %v582_v17 = vpop.f32.mrb[1].mxu0 }
  0xed   : > { %v374_v18 = vpop.f32.mrb[2].mxu0 }
  0xee   : > { %v441_v19 = vadd.f32 %v558_v15, %v428_v16  ;;  %v583_v20 = vpop.f32.mrb[3].mxu0 }
  0xf0   : > { %631 = vtanh.f32 %v441_v19 }
  0xfa   : > { %v632_v22 = vpop.eup %631 }
  0xfb   : > { %v450_v23 = vmul.f32 %v632_v22, %v559_v21 }
  0xfd   : > { %v451_v24 = vsel %vm389_vm2, %v450_v23, 0.0 }
  0xfe   : > { %452 = vadd.xlane.f32.xlu0 %v451_v24 }
 0x18b   : > { %v453_v29 = vpop.xlane.xlu0 %452 }
 0x18c   : > { %v460_v30 = vrot.slane %v453_v29, %v459_v28 }
 0x18e   : > { %464 = vst.msk [vmem:[%s462_s11] sm:$0x1] %vm463_vm4, %v460_v30 }
 0x18f   : > { %646 = shalt.err (!%p643_p12)
}
 0x190   : > { %s647_s14 = scalar_lea.hbm %s825_s6, 32 }
 0x191   : > { %p648_p13 = scmp.ne.s32.totalorder %s825_s6, %s647_s14  ;;  %p653_p2 = scmp.lt.u32.totalorder %s647_s14, %s825_s6 }
 0x193   : > { %p649_p0 = pnand %p648_p13, %p783_p5 }
 0x195   : > { %p650_p1 = pneg %p649_p0 }
 0x197   : > { %p655_p3 = pnand %p653_p2, %p650_p1 }
 0x199   : > { %658 = shalt.err (!%p655_p3)
}
 0x19a   : > { %593 = dma.vmem_to_hbm [thread:$0]  (%p783_p5), %s475_s9, 32, %s825_s6, [#allocation3]  }
 0x19b   : > { %672 = dma.done.wait (%p783_p5), [#allocation3], 32  }
 0x19c   : > { %674 = vsyncadd (%p783_p5), [#allocation3], 4294967264 }
 0x19d PF: > { %s17_s23 = sadd.s32 1, %s685_s23   ;;  %s827_s21 = smov %s681_s22 }
 0x19e   : > { %p14_p4 = scmp.ge.s32.totalorder %s17_s23, 4   ;;  %s828_s22 = smov %s830_s25 }
 0x1a0   :  { %16 = sbr.rel (!%p14_p4) target bundleno = 2 (0x2), region = 77 }
 0x1a7   :  { %487 = vsyncpa [#allocation3], 1 }
 0x1a8   :  { %489 = vsyncpa [#allocation3 + $0x1], 1 }

</bundles_post_ra>
